<compile_context>
chip_gen: v7x
topology: tpu7x:2x2x1
jax: 0.10.0
libtpu: 0.0.40
codegen_flags: <defaults>
</compile_context>

<pallas_src>
import functools
from collections import OrderedDict

import jax
import jax.numpy as jnp
from jax.experimental import pallas as pl
from jax.experimental.pallas import tpu as pltpu


# ---------------------------------------------------------------------------
# Tiling helpers
# ---------------------------------------------------------------------------
def _pick_tile(hw):
    """Largest divisor of hw that is a multiple of 16 and <= 512, preferring
    >= 2 tiles. Falls back to hw itself (full-extent block is always legal)."""
    best = None
    for tm in range(min(hw, 512), 15, -1):
        if hw % tm == 0 and tm % 16 == 0:
            if hw // tm >= 2:
                return tm
            if best is None:
                best = tm
    return best if best is not None else hw


def _maybe_vmem_limit(tm, c, add_residual):
    """Return an explicit vmem_limit_bytes only when the estimated per-step
    working set exceeds the default scoped limit (matters at C=2048)."""
    wt = c * c * 2 * 2                 # bf16 conv weight, worst-case double buffered
    xb = tm * c * 2 * 2                # bf16 x tile, double buffered
    yb = tm * c * 4 * 2                # f32/bf16 y tile, double buffered (f32 bound)
    rb = tm * c * 4 * 2 if add_residual else 0
    est = wt + xb + yb + rb + 8 * c * 4 + (1 << 20)
    if est <= 32 * 1024 * 1024:
        return None                    # default scoped VMEM limit is enough
    return min(int(est * 1.25), 100 * 1024 * 1024)


# ---------------------------------------------------------------------------
# Kernel 1: fused layer-block kernel.
#   grid = (B, nb, HW // TM); scalar-prefetch idx picks which block of the
#   previous layer's output slab each batch reads (fused hard-gumbel select).
#   per step: y = relu(x @ W + b) for one (TM, C) token tile. If nb > 1, a
#   running spatial max is kept in VMEM scratch and the score head (VPU mul +
#   lane reduce) is finalized on the last HW tile. Optionally fuses the final
#   residual add.
# ---------------------------------------------------------------------------
def _layer_kernel(idx_ref, x_ref, w_ref, b_ref, *rest, add_residual, compute_scores):
    del idx_ref  # consumed by the index_maps (scalar prefetch)
    rest = list(rest)
    sw_ref = sb_ref = res_ref = score_ref = pool_ref = None
    if compute_scores:
        sw_ref, sb_ref = rest[0], rest[1]
        rest = rest[2:]
    if add_residual:
        res_ref = rest[0]
        rest = rest[1:]
    y_ref = rest[0]
    rest = rest[1:]
    if compute_scores:
        score_ref, pool_ref = rest[0], rest[1]

    t = pl.program_id(2)

    if compute_scores:
        @pl.when(t == 0)
        def _init():
            pool_ref[...] = jnp.full(pool_ref.shape, -jnp.inf, dtype=pool_ref.dtype)

    x = x_ref[...]                                           # (TM, C) bf16
    y = jnp.dot(x, w_ref[...], preferred_element_type=jnp.float32)
    y = y + b_ref[...]                                       # (1, C) f32 bias
    y = jnp.maximum(y, 0.0)                                  # ReLU (f32)

    if compute_scores:
        # adaptive_max_pool2d(., 1): running max over the spatial (token) axis.
        pool_ref[...] = jnp.maximum(pool_ref[...], jnp.max(y, axis=0, keepdims=True))

    if add_residual:
        y = y + res_ref[...]                                 # f32 residual add
    y_ref[...] = y.astype(y_ref.dtype)

    if compute_scores:
        @pl.when(t == pl.num_programs(2) - 1)
        def _finalize():
            # Linear(C, 1) on the pooled vector as a VPU multiply + lane reduce
            # (avoids an M=1/N=1 MXU matmul).
            score = jnp.sum(pool_ref[...] * sw_ref[...], axis=1, keepdims=True)
            score_ref[...] = (score + sb_ref[...]).astype(score_ref.dtype)


def run_layer(x_bnhc, sel_idx, conv_w, conv_b, score_w, score_b,
              residual=None, tm=None):
    """x_bnhc: (B, nbx, HW, C) bf16 (nbx = #blocks of the PREVIOUS layer).
    sel_idx: (B,) int32 block chosen per batch from the previous layer.
    conv_w: (nb, C, C) bf16 (already x@W layout).
    Returns (ys, scores):
      nb == 1 -> ys (B, HW, C), scores None
      nb  > 1 -> ys (B, nb, HW, C), scores (B, nb) f32
    """
    B, nbx, HW, C = x_bnhc.shape
    nb = conv_w.shape[0]
    TM = _pick_tile(HW) if tm is None else tm
    n_tiles = HW // TM
    add_residual = residual is not None
    compute_scores = nb > 1
    out_dtype = jnp.float32 if add_residual else jnp.bfloat16

    kernel = functools.partial(_layer_kernel, add_residual=add_residual,
                               compute_scores=compute_scores)

    in_specs = [
        # previous-layer block selection fused into the load (scalar prefetch)
        pl.BlockSpec((None, None, TM, C), lambda b, n, t, idx: (b, idx[b], t, 0)),
        pl.BlockSpec((None, C, C), lambda b, n, t, idx: (n, 0, 0)),     # conv weight
        pl.BlockSpec((None, 1, C), lambda b, n, t, idx: (n, 0, 0)),     # conv bias
    ]
    args = [x_bnhc, conv_w, conv_b]
    if compute_scores:
        in_specs += [
            pl.BlockSpec((None, 1, C), lambda b, n, t, idx: (n, 0, 0)),  # score weight
            pl.BlockSpec((None, 1, 1), lambda b, n, t, idx: (n, 0, 0)),  # score bias
        ]
        args += [score_w, score_b]
    if add_residual:
        in_specs.append(pl.BlockSpec((None, TM, C), lambda b, n, t, idx: (b, t, 0)))
        args.append(residual)

    if nb == 1:
        out_specs = [pl.BlockSpec((None, TM, C), lambda b, n, t, idx: (b, t, 0))]
        out_shape = [jax.ShapeDtypeStruct((B, HW, C), out_dtype)]
    else:
        out_specs = [pl.BlockSpec((None, None, TM, C),
                                  lambda b, n, t, idx: (b, n, t, 0))]
        out_shape = [jax.ShapeDtypeStruct((B, nb, HW, C), out_dtype)]
    scratch = []
    if compute_scores:
        out_specs.append(pl.BlockSpec((1, 1), lambda b, n, t, idx: (b, n)))
        out_shape.append(jax.ShapeDtypeStruct((B, nb), jnp.float32))
        scratch.append(pltpu.VMEM((1, C), jnp.float32))      # running spatial max

    grid_spec = pltpu.PrefetchScalarGridSpec(
        num_scalar_prefetch=1,
        grid=(B, nb, n_tiles),
        in_specs=in_specs,
        out_specs=tuple(out_specs),
        scratch_shapes=tuple(scratch),
    )
    outs = pl.pallas_call(
        kernel,
        grid_spec=grid_spec,
        out_shape=tuple(out_shape),
        compiler_params=pltpu.CompilerParams(
            dimension_semantics=("parallel", "parallel",
                                 "arbitrary" if compute_scores else "parallel"),
            vmem_limit_bytes=_maybe_vmem_limit(TM, C, add_residual),
        ),
    )(sel_idx, *args)
    if compute_scores:
        return outs[0], outs[1]
    return outs[0], None


# ---------------------------------------------------------------------------
# Kernel 2 (only used for the LAST layer when num_blocks > 1): hard-gumbel
# block selection as an index-select with scalar prefetch -- only the chosen
# block's slab is DMA'd -- with the final residual add fused in.
# ---------------------------------------------------------------------------
def _select_kernel(idx_ref, ys_ref, *rest, add_residual):
    del idx_ref  # consumed by the index_maps (scalar prefetch)
    if add_residual:
        res_ref, o_ref = rest
        o_ref[...] = (ys_ref[...].astype(jnp.float32) + res_ref[...]).astype(o_ref.dtype)
    else:
        (o_ref,) = rest
        o_ref[...] = ys_ref[...].astype(o_ref.dtype)


def run_select(idx, ys, residual=None, tm=None):
    """idx: (B,) int32 chosen block per batch. ys: (B, nb, HW, C)."""
    B, nb, HW, C = ys.shape
    TM = _pick_tile(HW) if tm is None else tm
    n_tiles = HW // TM
    add_residual = residual is not None
    out_dtype = jnp.float32 if add_residual else jnp.bfloat16

    kernel = functools.partial(_select_kernel, add_residual=add_residual)

    in_specs = [
        pl.BlockSpec((None, None, TM, C), lambda b, t, idx_ref: (b, idx_ref[b], t, 0)),
    ]
    args = [idx, ys]
    if add_residual:
        in_specs.append(pl.BlockSpec((None, TM, C), lambda b, t, idx_ref: (b, t, 0)))
        args.append(residual)

    grid_spec = pltpu.PrefetchScalarGridSpec(
        num_scalar_prefetch=1,
        grid=(B, n_tiles),
        in_specs=in_specs,
        out_specs=pl.BlockSpec((None, TM, C), lambda b, t, idx_ref: (b, t, 0)),
    )
    return pl.pallas_call(
        kernel,
        grid_spec=grid_spec,
        out_shape=jax.ShapeDtypeStruct((B, HW, C), out_dtype),
        compiler_params=pltpu.CompilerParams(
            dimension_semantics=("parallel", "parallel")),
    )(*args)


# ---------------------------------------------------------------------------
# Glue: gumbel hard-argmax, parameter init, full forward, pure-JAX reference.
# ---------------------------------------------------------------------------
def gumbel_argmax_index(key, logits, tau=1.0):
    """Forward value of F.gumbel_softmax(..., hard=True) is a one-hot of
    argmax((logits + gumbel) / tau); we only need the argmax index."""
    u = jax.random.uniform(key, logits.shape, minval=1e-20, maxval=1.0)
    g = -jnp.log(-jnp.log(u))
    return jnp.argmax((logits + g) / tau, axis=1).astype(jnp.int32)


def init_params(key, num_layers, num_blocks, C):
    """Per layer: (conv_w (nb,C,C) bf16, conv_b (nb,1,C) f32,
                   score_w (nb,1,C) f32, score_b (nb,1,1) f32).
    conv_w is stored transposed relative to PyTorch Conv2d (C_out, C_in, 1, 1)
    so that y = x @ conv_w."""
    params = []
    scale = 1.0 / float(C) ** 0.5
    for li in range(num_layers):
        k = jax.random.fold_in(key, li)
        k1, k2, k3, k4 = jax.random.split(k, 4)
        conv_w = (jax.random.normal(k1, (num_blocks, C, C), jnp.float32) * scale
                  ).astype(jnp.bfloat16)
        conv_b = jax.random.normal(k2, (num_blocks, 1, C), jnp.float32) * 0.01
        score_w = jax.random.normal(k3, (num_blocks, 1, C), jnp.float32) * scale
        score_b = jax.random.normal(k4, (num_blocks, 1, 1), jnp.float32) * 0.01
        params.append((conv_w, conv_b, score_w, score_b))
    return params


def dynamic_forward(x_nchw, mask, params, gumbel_key, tm=None):
    """x_nchw: (B, C, H, W) f32. Returns OrderedDict {'layer0': (out_nchw, mask)}."""
    B, C, H, W = x_nchw.shape
    HW = H * W
    # NCHW -> (B, HW, C); keep the residual in f32, stream activations in bf16.
    residual = jnp.transpose(x_nchw, (0, 2, 3, 1)).reshape(B, HW, C)
    x = residual.astype(jnp.bfloat16).reshape(B, 1, HW, C)
    sel_idx = jnp.zeros((B,), jnp.int32)
    num_layers = len(params)
    out = None

    for li, (conv_w, conv_b, score_w, score_b) in enumerate(params):
        nb = conv_w.shape[0]
        last = li == num_layers - 1
        fuse_res = last and nb == 1   # residual add fused straight into the layer kernel

        ys, scores = run_layer(
            x, sel_idx, conv_w, conv_b, score_w, score_b,
            residual=residual if fuse_res else None, tm=tm)

        if nb == 1:
            # gumbel over a single block is always the one-hot [1.0]: identity combine.
            if last:
                out = ys                         # (B, HW, C) f32, residual fused
            else:
                x = ys.reshape(B, 1, HW, C)      # bf16 feeds next layer directly
                sel_idx = jnp.zeros((B,), jnp.int32)
        else:
            key = jax.random.fold_in(gumbel_key, li)
            idx = gumbel_argmax_index(key, scores)
            if last:
                # selection + final residual add (one small fused pass)
                out = run_select(idx, ys, residual=residual, tm=tm)
            else:
                # defer the selection: the next layer's x BlockSpec index-selects
                # block idx[b] via scalar prefetch (no intermediate HBM copy).
                x = ys
                sel_idx = idx

        if last:
            break

    out_nchw = jnp.transpose(out.astype(jnp.float32).reshape(B, H, W, C), (0, 3, 1, 2))
    # TODO(synk): NestedTensor has no JAX equivalent; return (tensor, mask) tuple.
    result = OrderedDict()
    result["layer0"] = (out_nchw, mask)
    return result


def reference_forward(x_nchw, params, gumbel_key):
    """Pure-JAX reference mirroring the kernels' dtype path (bf16 activations,
    f32 MXU accumulation, f32 residual add)."""
    B, C, H, W = x_nchw.shape
    res = jnp.transpose(x_nchw, (0, 2, 3, 1)).reshape(B, H * W, C)
    x = res.astype(jnp.bfloat16)
    num_layers = len(params)
    for li, (conv_w, conv_b, score_w, score_b) in enumerate(params):
        nb = conv_w.shape[0]
        ys, scores = [], []
        for n in range(nb):
            y = jnp.dot(x, conv_w[n], preferred_element_type=jnp.float32)
            y = jnp.maximum(y + conv_b[n], 0.0)                    # (B, HW, C) f32
            pooled = jnp.max(y, axis=1)                            # (B, C)
            s = jnp.sum(pooled * score_w[n, 0], axis=-1) + score_b[n, 0, 0]
            ys.append(y)
            scores.append(s)
        ys = jnp.stack(ys, axis=1)            # (B, nb, HW, C)
        scores = jnp.stack(scores, axis=1)    # (B, nb)
        if nb == 1:
            sel = ys[:, 0]
        else:
            key = jax.random.fold_in(gumbel_key, li)
            idx = gumbel_argmax_index(key, scores)
            sel = jnp.take_along_axis(ys, idx[:, None, None, None], axis=1)[:, 0]
        if li == num_layers - 1:
            # nb == 1: kernel keeps the last layer's y in f32 (fused residual);
            # nb  > 1: kernel stores bf16 ys then selects + adds residual in f32.
            x = sel if nb == 1 else sel.astype(jnp.bfloat16).astype(jnp.float32)
        else:
            x = sel.astype(jnp.bfloat16)
    out = res + x
    return jnp.transpose(out.reshape(B, H, W, C), (0, 3, 1, 2))


if __name__ == "__main__":
    # Small shapes consistent with the module (C stands in for 2048).
    B, C, H, W = 2, 128, 16, 16

    key = jax.random.PRNGKey(0)
    kx, kp, kg = jax.random.split(key, 3)
    x = jax.random.normal(kx, (B, C, H, W), jnp.float32)
    mask = jnp.zeros((B, H, W), jnp.bool_)

    # Default module config: num_blocks=1, num_layers=3.
    params1 = init_params(kp, num_layers=3, num_blocks=1, C=C)
    out = dynamic_forward(x, mask, params1, kg)
    out_tensor, out_mask = out["layer0"]
    jax.block_until_ready(out_tensor)
    assert out_tensor.shape == (B, C, H, W)
    assert out_mask.shape == (B, H, W)

    ref1 = reference_forward(x, params1, kg)
    err1 = float(jnp.max(jnp.abs(ref1 - out_tensor)))
    assert err1 < 2e-2, f"nb=1 max abs error {err1}"

    # num_blocks > 1 path (scalar-prefetch fused selection + final select kernel).
    params2 = init_params(kp, num_layers=2, num_blocks=2, C=C)
    out2 = dynamic_forward(x, mask, params2, kg)
    out2_tensor, _ = out2["layer0"]
    jax.block_until_ready(out2_tensor)
    assert out2_tensor.shape == (B, C, H, W)

    ref2 = reference_forward(x, params2, kg)
    err2 = float(jnp.max(jnp.abs(ref2 - out2_tensor)))
    assert err2 < 2e-2, f"nb=2 max abs error {err2}"

    print("KERNEL_OK")
</pallas_src>

<mosaic_0001>
module attributes {stable_mosaic.version = 11 : i64} {
  func.func @_layer_kernel(%arg0: i32, %arg1: i32, %arg2: i32, %arg3: memref<2xi32, #tpu.memory_space<smem>>, %arg4: memref<1x1x128x128xbf16, #tpu.memory_space<vmem>>, %arg5: memref<1x128x128xbf16, #tpu.memory_space<vmem>>, %arg6: memref<1x1x128xf32, #tpu.memory_space<vmem>>, %arg7: memref<1x128x128xbf16, #tpu.memory_space<vmem>>) attributes {dimension_semantics = [#tpu.dimension_semantics<parallel>, #tpu.dimension_semantics<parallel>, #tpu.dimension_semantics<parallel>], iteration_bounds = array<i64: 2, 1, 2>, scalar_prefetch = 1 : i64, scratch_operands = 0 : i64, tpu.core_type = #tpu.core_type<tc>, window_params = [{transform_indices = @transform_0, window_bounds = array<i64: 1, 1, 128, 128>}, {transform_indices = @transform_1, window_bounds = array<i64: 1, 128, 128>}, {transform_indices = @transform_2, window_bounds = array<i64: 1, 1, 128>}, {transform_indices = @transform_3, window_bounds = array<i64: 1, 128, 128>}]} {
    %c0 = arith.constant 0 : index
    %c0_0 = arith.constant 0 : index
    %c0_1 = arith.constant 0 : index
    %c0_2 = arith.constant 0 : index
    %0 = vector.load %arg4[%c0, %c0_0, %c0_1, %c0_2] : memref<1x1x128x128xbf16, #tpu.memory_space<vmem>>, vector<1x1x128x128xbf16>
    %1 = vector.shape_cast %0 : vector<1x1x128x128xbf16> to vector<128x128xbf16>
    %c0_3 = arith.constant 0 : index
    %c0_4 = arith.constant 0 : index
    %c0_5 = arith.constant 0 : index
    %2 = vector.load %arg5[%c0_3, %c0_4, %c0_5] : memref<1x128x128xbf16, #tpu.memory_space<vmem>>, vector<1x128x128xbf16>
    %3 = vector.shape_cast %2 : vector<1x128x128xbf16> to vector<128x128xbf16>
    %cst = arith.constant dense<0.000000e+00> : vector<128x128xf32>
    %4 = tpu.matmul %1, %3, %cst {dimension_numbers = #tpu.dot_dimension_numbers<[1], [0], [0], [1], [0, 0, 1, 1], [], []>} : vector<128x128xbf16>, vector<128x128xbf16>, vector<128x128xf32> -> vector<128x128xf32>
    %c0_6 = arith.constant 0 : index
    %c0_7 = arith.constant 0 : index
    %c0_8 = arith.constant 0 : index
    %5 = vector.load %arg6[%c0_6, %c0_7, %c0_8] : memref<1x1x128xf32, #tpu.memory_space<vmem>>, vector<1x1x128xf32>
    %6 = vector.shape_cast %5 : vector<1x1x128xf32> to vector<1x128xf32>
    %7 = vector.broadcast %6 : vector<1x128xf32> to vector<128x128xf32>
    %8 = arith.addf %4, %7 : vector<128x128xf32>
    %cst_9 = arith.constant 0.000000e+00 : f32
    %9 = vector.broadcast %cst_9 : f32 to vector<128x128xf32>
    %10 = arith.maximumf %8, %9 : vector<128x128xf32>
    %11 = arith.truncf %10 : vector<128x128xf32> to vector<128x128xbf16>
    %c0_10 = arith.constant 0 : index
    %c0_11 = arith.constant 0 : index
    %c0_12 = arith.constant 0 : index
    %12 = vector.load %arg7[%c0_10, %c0_11, %c0_12] : memref<1x128x128xbf16, #tpu.memory_space<vmem>>, vector<1x128x128xbf16>
    %13 = vector.shape_cast %12 : vector<1x128x128xbf16> to vector<128x128xbf16>
    %14 = vector.shape_cast %11 : vector<128x128xbf16> to vector<1x128x128xbf16>
    tpu.vector_store %arg7[%c0_10, %c0_11, %c0_12], %14 {strides = array<i32>} : memref<1x128x128xbf16, #tpu.memory_space<vmem>>, vector<1x128x128xbf16>,
    return
  }
  func.func @transform_0(%arg0: i32, %arg1: i32, %arg2: i32, %arg3: memref<2xi32, #tpu.memory_space<smem>>) -> (i32, i32, i32, i32) {
    %0 = arith.index_cast %arg0 : i32 to index
    %1 = memref.load %arg3[%0] : memref<2xi32, #tpu.memory_space<smem>>
    %c0_i32 = arith.constant 0 : i32
    %c0_i32_0 = arith.constant 0 : i32
    return %arg0, %1, %arg2, %c0_i32 : i32, i32, i32, i32
  }
  func.func @transform_1(%arg0: i32, %arg1: i32, %arg2: i32, %arg3: memref<2xi32, #tpu.memory_space<smem>>) -> (i32, i32, i32) {
    %c0_i32 = arith.constant 0 : i32
    %c0_i32_0 = arith.constant 0 : i32
    %c0_i32_1 = arith.constant 0 : i32
    return %arg1, %c0_i32, %c0_i32_0 : i32, i32, i32
  }
  func.func @transform_2(%arg0: i32, %arg1: i32, %arg2: i32, %arg3: memref<2xi32, #tpu.memory_space<smem>>) -> (i32, i32, i32) {
    %c0_i32 = arith.constant 0 : i32
    %c0_i32_0 = arith.constant 0 : i32
    %c0_i32_1 = arith.constant 0 : i32
    return %arg1, %c0_i32, %c0_i32_0 : i32, i32, i32
  }
  func.func @transform_3(%arg0: i32, %arg1: i32, %arg2: i32, %arg3: memref<2xi32, #tpu.memory_space<smem>>) -> (i32, i32, i32) {
    %c0_i32 = arith.constant 0 : i32
    %c0_i32_0 = arith.constant 0 : i32
    return %arg0, %arg2, %c0_i32 : i32, i32, i32
  }
}

</mosaic_0001>

<bundles_post_ra>
// kernel: tpu_custom_call.1
= control target key start
LH: loop header
LB: loop body
LE: loop exit
PB: predicated region body
PF: predicated region fallthrough
CT: control target
= control target key end

     0   :  { %s1594_s0 = inlined_call_operand.hbm [shape: s32[2], index: 0, kind: input, shape index: {}]   ;;  %s1595_s1 = inlined_call_operand.hbm [shape: bf16[2,1,256,128], index: 1, kind: input, shape index: {}]   ;;  %s1596_s2 = inlined_call_operand.hbm [shape: bf16[1,128,128], index: 2, kind: input, shape index: {}]   ;;  %s1597_s3 = inlined_call_operand.vmem [shape: f32[1,1,128], index: 3, kind: input, shape index: {}]   ;;  %s1598_s4 = inlined_call_operand.hbm [shape: bf16[2,256,128], index: 4, kind: output, shape index: {}]  }
   0x1   :  { %1614 = sst [smem:[#allocation23_spill]] %s1596_s2  ;;  %s1049_s17 = scalar_lea.hbm %s1594_s0, 16 }
   0x2   :  { %1615 = sst [smem:[#allocation24_spill]] %s1598_s4  ;;  %p1050_p0 = scmp.ne.s32.totalorder %s1594_s0, %s1049_s17 }
   0x3   :  { %p1053_p1 = scmp.lt.u32.totalorder %s1049_s17, %s1594_s0 }
   0x5   :  { %p1055_p2 = pnand %p1053_p1, %p1050_p0 }
   0x7   :  { %1058 = shalt.err (!%p1055_p2)  }
   0x8   :  { %s1247_s22 = smov [#allocation3]  }
   0x9   :  { %10 = dma.hbm_to_smem %s1594_s0, 16, %s1247_s22, [#allocation2] }
   0xa   :  { %1189 = dma.done.wait [#allocation2], 16 }
   0xb   :  { %1190 = vsyncadd [#allocation2], 4294967280 }
   0xc   :  { %12 = sfence }
   0xd   :  { %13 = vsyncpa [#allocation5], 0 }
   0xe   :  { %15 = vsyncpa [#allocation5 + $0x1], 0 }
   0xf   :  { %16 = vsyncpa [#allocation8], 0 }
  0x10   :  { %17 = vsyncpa [#allocation6], 0 }
  0x11   :  { %19 = vsyncpa [#allocation6 + $0x1], 0  ;;  %s1292_s25 = smov 0   ;;  %s1294_s26 = smov 0  }
  0x12   :  { %s1296_s27 = smov 0   ;;  %s1298_s28 = smov 0  }
  0x13   :  { %s1300_s29 = smov 0   ;;  %s1302_s30 = smov 0  }
  0x14   :  { %s1304_s0 = smov 0   ;;  %s1306_s5 = smov 0  }
  0x15   :  { %s1308_s6 = smov 0   ;;  %s1310_s7 = smov 0  }
  0x16   :  { %s1312_s8 = smov 0  }
  0x17 LB: > { %1616 = sst [smem:[#allocation16_spill]] %s1205_s25  ;;  %s730_s9 = sadd.s32 4294967295, %s1245_s8   ;;  %s1245_s8 = sphi %s1312_s8, %s25_s8   ;;  %s1241_s7 = sphi %s1310_s7, %s1655_s7   ;;  %s1237_s6 = sphi %s1308_s6, %s1654_s6   ;;  %s1233_s5 = sphi %s1306_s5, %s1653_s5   ;;  %s1229_s0 = sphi %s1304_s0, %s1652_s0   ;;  %s1225_s30 = sphi %s1302_s30, %s1644_s30   ;;  %s1221_s29 = sphi %s1300_s29, %s1651_s29   ;;  %s1217_s28 = sphi %s1298_s28, %s1650_s28   ;;  %s1213_s27 = sphi %s1296_s27, %s1649_s27   ;;  %s1209_s26 = sphi %s1294_s26, %s1648_s26   ;;  %s1205_s25 = sphi %s1292_s25, %s1647_s25  }
  0x18   : > { %1617 = sst [smem:[#allocation17_spill]] %s1225_s30  ;;  %s731_s10 = sadd.s32 4294967294, %s1245_s8  }
  0x19   : > { %p70_p3 = scmp.ne.s32.totalorder %s1221_s29, %s1217_s28  ;;  %p1348_p4 = scmp.eq.s32.totalorder %s730_s9, 0 }
  0x1a   : > { %p147_p5 = scmp.ne.s32.totalorder %s1213_s27, %s1209_s26  ;;  %p148_p7 = scmp.eq.s32.totalorder %s730_s9, 3 }
  0x1b   : > { %s1618_s11 = scalar_select %p1348_p4, 1, 0 }
  0x1c   : > { %p1356_p6 = por %p1348_p4, %p70_p3  ;;  %p153_p8 = scmp.ne.s32.totalorder %s1209_s26, %s1205_s25 }
  0x1d   : > { %p154_p9 = scmp.eq.s32.totalorder %s731_s10, 3  ;;  %p1362_p10 = por %p148_p7, %p147_p5 }
  0x1e   : > { %s1619_s12 = scalar_select %p1356_p6, 1, 0 }
  0x1f   : > { %s1620_s13 = scalar_select %p1362_p10, 1, 0 }
  0x20   : > { %p732_p11 = scmp.ge.s32.totalorder %s1245_s8, 1  ;;  %p1367_p12 = por %p154_p9, %p153_p8 }
  0x21   : > { %1621 = sst [smem:[#allocation18_spill]] %s1620_s13  ;;  %p161_p13 = scmp.lt.s32.totalorder %s1245_s8, 5 }
  0x22   : > { %s1622_s14 = scalar_select %p1367_p12, 1, 0 }
  0x23   : > { %p1372_p0 = pnand %p732_p11, %p161_p13  ;;  %s1248_s16 = smov [#allocation7]  }
  0x24   : > { %1623 = sst [smem:[#allocation19_spill]] %s1622_s14  ;;  %s176_s17 = sshll.u32 %s1248_s16, 4  ;;  %s177_s17 = int_to_ptr.vmem [resolvable:$true] %s176_s17 }
  0x25   : > { %s1624_s15 = scalar_select %p1372_p0, 1, 0 }
  0x26   : > { %p921_p1 = pneg %p1372_p0  ;;  %s1626_s2 = sld [smem:[#allocation23_spill]] }
  0x28   : > { %p1380_p2 = pnand %p921_p1, %p1348_p4 }
  0x2a   : > { %p1061_p5 = pneg %p1380_p2 }
  0x2c   : > { %s1059_s21 = scalar_lea.hbm %s1626_s2, 1024 }
  0x2d   : > { %p1060_p3 = scmp.ne.s32.totalorder %s1626_s2, %s1059_s21  ;;  %p1066_p9 = scmp.lt.u32.totalorder %s1059_s21, %s1626_s2 }
  0x2f   : > { %p1062_p7 = pnand %p1061_p5, %p1060_p3 }
  0x31   : > { %p1063_p8 = pneg %p1062_p7 }
  0x33   : > { %p1068_p11 = pnand %p1066_p9, %p1063_p8 }
  0x35   : > { %1071 = shalt.err (!%p1068_p11)
}
  0x36   : > { %s1072_s9 = scalar_lea.vmem %s177_s17, 1024  ;;  %p1080_p10 = scmp.lt.s32.totalorder %s177_s17, %s177_s17 }
  0x37   : > { %p1073_p13 = scmp.ne.s32.totalorder %s177_s17, %s1072_s9  ;;  %p1081_p4 = scmp.lt.s32.totalorder %s1072_s9, %s1072_s9 }
  0x39   : > { %p1075_p1 = pnand %p1073_p13, %p1061_p5  ;;  %p1082_p6 = por %p1081_p4, %p1080_p10 }
  0x3b   : > { %p1076_p12 = pneg %p1075_p1 }
  0x3d   : > { %p1083_p0 = pnand %p1082_p6, %p1076_p12 }
  0x3f   : > { %1086 = shalt.err (!%p1083_p0)
}
  0x40   : > { %s1604_s10 = smov 64   ;;  %s1605_s16 = smov 4  }
  0x41   : > { %924 = dma.hbm_to_vmem [thread:$0]  (!%p1380_p2), %s1626_s2, 1024, %s177_s17, [#allocation8], %s1604_s10, %s1604_s10, %s1605_s16  }
  0x42   : > { %s37_s21 = sadd.s32 1, %s1237_s6  ;;  %s44_s22 = sadd.s32 1, %s1241_s7 }
  0x43   : > { %p38_p4 = scmp.ge.s32.totalorder %s37_s21, 2  ;;  %p64_p6 = scmp.ne.s32.totalorder %s1225_s30, %s1221_s29 }
  0x44   : > { %p65_p12 = scmp.eq.s32.totalorder %s1245_s8, 0  ;;  %s48_s18 = sld [smem:[#allocation3 + %s1241_s7]] }
  0x45   : > { %s1657_s21 = smov (%p38_p4, %s37_s21), 0  ;;  %s1659_s22 = smov (!%p38_p4, %s44_s22), %s1241_s7 }
  0x46   : > { %1627 = sst [smem:[#allocation20_spill]] %s1657_s21  ;;  %p46_p10 = scmp.ge.s32.totalorder %s1659_s22, 2 }
  0x47   : > { %s53_s23 = ssub.s32 %s1237_s6, %s1657_s21  ;;  %p1416_p0 = por %p65_p12, %p64_p6 }
  0x48   : > { %s1661_s22 = smov (%p46_p10, %s1659_s22), 0  ;;  %s137_s9 = sadd.s32 1, %s1213_s27 }
  0x49   : > { %1628 = sst [smem:[#allocation21_spill]] %s1661_s22  ;;  %s50_s28 = ssub.s32 %s1241_s7, %s1661_s22 }
  0x4a   : > { %s49_s24 = sld [smem:[#allocation3 + %s1661_s22]]  ;;  %s134_s19 = sor.u32 %s53_s23, %s50_s28 }
  0x4b   : > { %p135_p2 = scmp.eq.s32.totalorder %s134_s19, 0  ;;  %p936_p3 = scmp.lt.s32.totalorder %s1245_s8, 4 }
  0x4c   : > { %s913_s20 = scalar_select %p1416_p0, [#allocation3], [#allocation10] }
  0x4d   : > { %s1427_s10 = scalar_select %p135_p2, %s1213_s27, %s137_s9  }
  0x4e   : > { %s914_s16 = scalar_select %p1416_p0, %s1241_s7, 0 }
  0x4f   : > { %s57_s25 = sadd.s32 1, %s1225_s30  ;;  %s196_s4 = sand.u32 1, %s1225_s30  }
  0x50   : > { %s51_s2 = ssub.s32 %s48_s18, %s49_s24  ;;  %s1663_s20 = smov (!%p936_p3, %s913_s20), [#allocation11] }
  0x51   : > { %s52_s21 = sor.u32 %s51_s2, %s50_s28  ;;  %s1665_s16 = smov (!%p936_p3, %s914_s16), 0 }
  0x52   : > { %s54_s14 = sor.u32 %s53_s23, %s52_s21  ;;  %s736_s19 = sshll.u32 %s196_s4, 6 }
  0x53   : > { %p55_p5 = scmp.eq.s32.totalorder %s54_s14, 0  ;;  %p1440_p7 = pnand %p936_p3, %p1416_p0 }
  0x54   : > { %s201_s9 = sld [smem:[%s1663_s20 + %s1665_s16]]  ;;  %s737_s18 = sshll.u32 %s1237_s6, 4 }
  0x55   : > { %s1436_s22 = scalar_select %p55_p5, %s1225_s30, %s57_s25  }
  0x56   : > { %s739_s24 = sshll.u32 %s1241_s7, 5  ;;  %s200_s2 = scalar_lea.vmem [#allocation4], %s736_s19 }
  0x57   : > { %1630 = sst [smem:[#allocation22_spill]] %s1436_s22  ;;  %s212_s21 = sshll.u32 %s200_s2, 4  ;;  %s1446_s21 = int_to_ptr.vmem [resolvable:$true] %s212_s21 }
  0x58   : > { %s1453_s16 = scalar_lea.sflag [#allocation5], %s196_s4  ;;  %p1089_p9 = pneg %p1440_p7 }
  0x59   : > { %s1092_s30 = scalar_lea.hbm %s1595_s1, 4096 }
  0x5a   : > { %s738_s23 = sshll.u32 %s201_s9, 5 }
  0x5b   : > { %s207_s14 = sadd.s32 %s738_s23, %s737_s18 }
  0x5c   : > { %s209_s28 = sadd.s32 %s739_s24, %s207_s14 }
  0x5d   : > { %s740_s25 = sshll.u32 %s209_s28, 6 }
  0x5e   : > { %s1451_s17 = scalar_lea.hbm %s1595_s1, %s740_s25 }
  0x5f   : > { %s1087_s20 = scalar_lea.hbm %s1451_s17, 1024  ;;  %p1093_p1 = scmp.lt.u32.totalorder %s1451_s17, %s1595_s1 }
  0x60   : > { %p1088_p8 = scmp.ne.s32.totalorder %s1451_s17, %s1087_s20  ;;  %p1094_p4 = scmp.lt.u32.totalorder %s1092_s30, %s1087_s20 }
  0x61   : > { %p1096_p10 = scmp.lt.u32.totalorder %s1087_s20, %s1451_s17 }
  0x62   : > { %p1090_p11 = pnand %p1089_p9, %p1088_p8  ;;  %p1095_p6 = por %p1094_p4, %p1093_p1 }
  0x64   : > { %p1091_p13 = pneg %p1090_p11  ;;  %p1097_p12 = por %p1096_p10, %p1095_p6 }
  0x66   : > { %p1098_p0 = pnand %p1097_p12, %p1091_p13 }
  0x68   : > { %1101 = shalt.err (!%p1098_p0)
}
  0x69   : > { %s1102_s4 = scalar_lea.vmem %s1446_s21, 1024  ;;  %s1251_s24 = smov [#allocation4]  }
  0x6a   : > { %p1103_p2 = scmp.ne.s32.totalorder %s1446_s21, %s1102_s4  ;;  %s1107_s2 = sshll.u32 %s1251_s24, 4  ;;  %s1108_s2 = int_to_ptr.vmem [resolvable:$false] %s1107_s2 }
  0x6b   : > { %s1109_s23 = scalar_lea.vmem %s1108_s2, 2048  ;;  %p1110_p8 = scmp.lt.s32.totalorder %s1446_s21, %s1108_s2 }
  0x6c   : > { %p1105_p3 = pnand %p1103_p2, %p1089_p9  ;;  %p1111_p11 = scmp.lt.s32.totalorder %s1109_s23, %s1102_s4 }
  0x6e   : > { %p1106_p5 = pneg %p1105_p3  ;;  %p1112_p1 = por %p1111_p11, %p1110_p8 }
  0x70   : > { %p1113_p4 = pnand %p1112_p1, %p1106_p5 }
  0x72   : > { %1116 = shalt.err (!%p1113_p4)
}
  0x73   : > { %s1632_s14 = smov 4   ;;  %s1633_s28 = smov 64  }
  0x74   : > { %930 = dma.hbm_to_vmem [thread:$0]  (!%p1440_p7), %s1451_s17, 1024, %s1446_s21, %s1453_s16, %s1633_s28, %s1633_s28, %s1632_s14  }
  0x75   : > { %p1634_p9 = scmp.ne.s32.totalorder %s1624_s15, 0 }
  0x76   : > { %s226_s25 = sand.u32 (!%p1634_p9), 1, %s1221_s29   ;;  %p1635_p13 = scmp.ne.s32.totalorder (!%p1634_p9), %s1619_s12, 0 }
  0x77   : > { %224 = sbr.rel (%p1634_p9) target bundleno = 407 (0x197), region = 32  ;;  %s742_s20 = sshll.u32 (!%p1634_p9), %s226_s25, 6 }
  0x78   : > { %s227_s19 = scalar_lea.sflag (!%p1634_p9), [#allocation5], %s226_s25  ;;  %s1487_s9 = scalar_lea.vmem (!%p1634_p9), [#allocation4], %s742_s20 }
  0x7e   : > { %1192 = dma.done.wait (%p1635_p13), %s227_s19, 1024  }
  0x7f   : > { %1194 = vsyncadd (%p1635_p13), %s227_s19, 4294966272  ;;  %p1636_p6 = scmp.ne.s32.totalorder %s1618_s11, 0 }
  0x81   : > { %1196 = dma.done.wait (%p1636_p6), [#allocation8], 1024  }
  0x82   : > { %1198 = vsyncadd (%p1636_p6), [#allocation8], 4294966272  ;;  %v1033_v0 = vld [vmem:[#allocation7] sm:$0xff]   ;;  %v1034_v1 = vld [vmem:[#allocation7 + $0x8] sm:$0xff]   ;;  %s257_s13 = sand.u32 1, %s1209_s26   ;;  %s779_s21 = sshll.u32 %s1229_s0, 4 }
  0x83   : > { %863 = vmatprep.subr.bf16.mxu0 %v1033_v0  ;;  %895 = vmatprep.subr.bf16.mxu1 %v1033_v0  ;;  %v1035_v2 = vld [vmem:[#allocation7 + $0x10] sm:$0xff]   ;;  %v1036_v3 = vld [vmem:[#allocation7 + $0x18] sm:$0xff]   ;;  %v1041_v4 = vld [vmem:[%s1487_s9] sm:$0xff]   ;;  %s744_s15 = sshll.u32 %s257_s13, 6  ;;  %s780_s17 = sshll.u32 %s1233_s5, 5 }
  0x84   : > { %864 = vmatpush3.bf16.msra.mxu0 %v1033_v0  ;;  %903 = vmatpush3.bf16.msra.mxu1 %v1033_v0  ;;  %v1042_v5 = vld [vmem:[%s1487_s9 + $0x20] sm:$0xff]   ;;  %v1038_v7 = vld [vmem:[#allocation7 + $0x28] sm:$0xff]   ;;  %v1039_v8 = vld [vmem:[#allocation7 + $0x30] sm:$0xff]   ;;  %s1513_s16 = scalar_lea.vmem [#allocation9], %s744_s15  ;;  %s608_s0 = sadd.s32 %s780_s17, %s779_s21 }
  0x85   : > { %865 = vmatprep.subr.bf16.mxu0 %v1034_v1  ;;  %896 = vmatprep.subr.bf16.mxu1 %v1034_v1  ;;  %v1037_v6 = vld [vmem:[#allocation7 + $0x20] sm:$0xff]   ;;  %v1040_v9 = vld [vmem:[#allocation7 + $0x38] sm:$0xff]   ;;  %v1043_v10 = vld [vmem:[%s1487_s9 + $0x8] sm:$0xff]   ;;  %s611_s5 = sshll.u32 %s1513_s16, 4  ;;  %s781_s30 = sshll.u32 %s608_s0, 6  ;;  %s1520_s5 = int_to_ptr.vmem [resolvable:$true] %s611_s5 }
  0x86   : > { %879 = vmatprep.mubr.bf16.mxu0 %v1041_v4  ;;  %887 = vmatprep.mubr.bf16.mxu1 %v1042_v5  ;;  %v1044_v11 = vld [vmem:[%s1487_s9 + $0x28] sm:$0xff]   ;;  %v1045_v12 = vld [vmem:[%s1487_s9 + $0x10] sm:$0xff]   ;;  %v1047_v14 = vld [vmem:[%s1487_s9 + $0x18] sm:$0xff]   ;;  %s1637_s22 = sld [smem:[#allocation18_spill]]  ;;  %s1638_s24 = sld [smem:[#allocation24_spill]] }
  0x87   : > { %v1046_v13 = vld [vmem:[%s1487_s9 + $0x30] sm:$0xff]   ;;  %v1048_v15 = vld [vmem:[%s1487_s9 + $0x38] sm:$0xff]   ;;  %v745_v16 = vld [vmem:[%s1597_s3] ss:$0 sm:$0xff]  ;;  %s1533_s23 = scalar_lea.sflag [#allocation6], %s257_s13  ;;  %s1117_s14 = scalar_lea.vmem %s1520_s5, 1024 }
  0x88   : > { %866 = vmatpush3.bf16.msra.mxu0 %v1034_v1  ;;  %904 = vmatpush3.bf16.msra.mxu1 %v1034_v1  ;;  %p1118_p7 = scmp.ne.s32.totalorder %s1520_s5, %s1117_s14  ;;  %s1252_s28 = smov [#allocation9]  }
  0x89   : > { %867 = vmatprep.subr.bf16.mxu0 %v1035_v2  ;;  %897 = vmatprep.subr.bf16.mxu1 %v1035_v2  ;;  %s1121_s25 = sshll.u32 %s1252_s28, 4  ;;  %s1122_s25 = int_to_ptr.vmem [resolvable:$false] %s1121_s25 }
  0x8a   : > { %s1123_s20 = scalar_lea.vmem %s1122_s25, 2048  ;;  %p1124_p2 = scmp.lt.s32.totalorder %s1520_s5, %s1122_s25 }
  0x8b   : > { %p1125_p3 = scmp.lt.s32.totalorder %s1123_s20, %s1117_s14 }
  0x8c   : > { %868 = vmatpush3.bf16.msra.mxu0 %v1035_v2  ;;  %905 = vmatpush3.bf16.msra.mxu1 %v1035_v2  ;;  %s1525_s2 = scalar_lea.hbm %s1638_s24, %s781_s30  ;;  %p1639_p10 = scmp.ne.s32.totalorder %s1637_s22, 0 }
  0x8d   : > { %869 = vmatprep.subr.bf16.mxu0 %v1036_v3  ;;  %898 = vmatprep.subr.bf16.mxu1 %v1036_v3  ;;  %p1126_p5 = por %p1125_p3, %p1124_p2 }
  0x8e   : > { %p1119_p12 = pnand %p1118_p7, %p1639_p10 }
  0x90   : > { %870 = vmatpush3.bf16.msra.mxu0 %v1036_v3  ;;  %906 = vmatpush3.bf16.msra.mxu1 %v1036_v3  ;;  %p1120_p0 = pneg %p1119_p12 }
  0x91   : > { %871 = vmatprep.subr.bf16.mxu0 %v1037_v6  ;;  %899 = vmatprep.subr.bf16.mxu1 %v1037_v6 }
  0x92   : > { %p1127_p8 = pnand %p1126_p5, %p1120_p0 }
  0x94   : > { %872 = vmatpush3.bf16.msra.mxu0 %v1037_v6  ;;  %907 = vmatpush3.bf16.msra.mxu1 %v1037_v6 }
  0x95   : > { %873 = vmatprep.subr.bf16.mxu0 %v1038_v7  ;;  %900 = vmatprep.subr.bf16.mxu1 %v1038_v7 }
  0x98   : > { %874 = vmatpush3.bf16.msra.mxu0 %v1038_v7  ;;  %908 = vmatpush3.bf16.msra.mxu1 %v1038_v7 }
  0x99   : > { %875 = vmatprep.subr.bf16.mxu0 %v1039_v8  ;;  %901 = vmatprep.subr.bf16.mxu1 %v1039_v8 }
  0x9c   : > { %876 = vmatpush3.bf16.msra.mxu0 %v1039_v8  ;;  %909 = vmatpush3.bf16.msra.mxu1 %v1039_v8 }
  0x9d   : > { %877 = vmatprep.subr.bf16.mxu0 %v1040_v9  ;;  %902 = vmatprep.subr.bf16.mxu1 %v1040_v9 }
  0xa0   : > { %878 = vmatpush3.bf16.msra.mxu0 %v1040_v9  ;;  %910 = vmatpush3.bf16.msra.mxu1 %v1040_v9 }
  0xa3   : > { %880 = vmatmul.mubr.bf16.vlgmr.msra.gmra.mrb[0].mxu0 %v1043_v10  ;;  %888 = vmatmul.mubr.bf16.vlgmr.msra.gmra.mrb[0].mxu1 %v1044_v11 }
  0xa4   : > { %883 = vmatprep.mubr.bf16.mxu0 %v1045_v12  ;;  %891 = vmatprep.mubr.bf16.mxu1 %v1046_v13 }
  0xab   : > { %884 = vmatmul.mubr.bf16.gmra.mrb[4].mxu0 %v1047_v14  ;;  %892 = vmatmul.mubr.bf16.gmra.mrb[4].mxu1 %v1048_v15 }
 0x176   : > { %v881_v17 = vpop.f32.mrb[0].mxu0  ;;  %v889_v18 = vpop.f32.mrb[0].mxu1 }
 0x177   : > { %v445_v19 = vadd.f32 %v881_v17, %v745_v16  ;;  %v477_v20 = vadd.f32 %v889_v18, %v745_v16  ;;  %v436_v21 = vpop.f32.mrb[1].mxu0  ;;  %v468_v22 = vpop.f32.mrb[1].mxu1 }
 0x178   : > { %v437_v23 = vadd.f32 %v745_v16, %v436_v21  ;;  %v469_v24 = vadd.f32 %v745_v16, %v468_v22  ;;  %v882_v25 = vpop.f32.mrb[2].mxu0  ;;  %v890_v26 = vpop.f32.mrb[2].mxu1 }
 0x179   : > { %v448_v27 = vadd.f32 %v882_v25, %v745_v16  ;;  %v480_v28 = vadd.f32 %v890_v26, %v745_v16  ;;  %v439_v29 = vpop.f32.mrb[3].mxu0  ;;  %v471_v30 = vpop.f32.mrb[3].mxu1  ;;  %v501_v33 = vmax.f32 %v445_v19, 0.0  ;;  %v509_v34 = vmax.f32 %v477_v20, 0.0 }
 0x17a   : > { %v440_v31 = vadd.f32 %v745_v16, %v439_v29  ;;  %v472_v32 = vadd.f32 %v745_v16, %v471_v30  ;;  %v499_v37 = vmax.f32 %v437_v23, 0.0  ;;  %v507_v38 = vmax.f32 %v469_v24, 0.0 }
 0x17b   : > { %v502_v35 = vmax.f32 %v448_v27, 0.0  ;;  %v510_v36 = vmax.f32 %v480_v28, 0.0 }
 0x17c   : > { %v500_v39 = vmax.f32 %v440_v31, 0.0  ;;  %v508_v40 = vmax.f32 %v472_v32, 0.0 }
 0x17d   : > { %v808_v41 = vpack.c.bf16 %v502_v35, %v501_v33  ;;  %v828_v42 = vpack.c.bf16 %v510_v36, %v509_v34 }
 0x17e   : > { %v803_v43 = vpack.c.bf16 %v500_v39, %v499_v37  ;;  %v823_v44 = vpack.c.bf16 %v508_v40, %v507_v38  ;;  %v885_v45 = vpop.f32.mrb[4].mxu0  ;;  %v893_v46 = vpop.f32.mrb[4].mxu1 }
 0x17f   : > { %840 = vst [vmem:[%s1513_s16 + $0x8] sm:$0xff] %v808_v41   ;;  %844 = vst [vmem:[%s1513_s16 + $0x28] sm:$0xff] %v828_v42   ;;  %v461_v47 = vadd.f32 %v885_v45, %v745_v16  ;;  %v493_v48 = vadd.f32 %v893_v46, %v745_v16  ;;  %v452_v49 = vpop.f32.mrb[5].mxu0  ;;  %v484_v50 = vpop.f32.mrb[5].mxu1 }
 0x180   : > { %804 = vst [vmem:[%s1513_s16] sm:$0xff] %v803_v43   ;;  %843 = vst [vmem:[%s1513_s16 + $0x20] sm:$0xff] %v823_v44   ;;  %v453_v51 = vadd.f32 %v745_v16, %v452_v49  ;;  %v485_v52 = vadd.f32 %v745_v16, %v484_v50  ;;  %v886_v53 = vpop.f32.mrb[6].mxu0  ;;  %v894_v54 = vpop.f32.mrb[6].mxu1 }
 0x181   : > { %v464_v55 = vadd.f32 %v886_v53, %v745_v16  ;;  %v496_v56 = vadd.f32 %v894_v54, %v745_v16  ;;  %v455_v57 = vpop.f32.mrb[7].mxu0  ;;  %v487_v58 = vpop.f32.mrb[7].mxu1  ;;  %v505_v61 = vmax.f32 %v461_v47, 0.0  ;;  %v513_v62 = vmax.f32 %v493_v48, 0.0 }
 0x182   : > { %v456_v59 = vadd.f32 %v745_v16, %v455_v57  ;;  %v488_v60 = vadd.f32 %v745_v16, %v487_v58  ;;  %v503_v1 = vmax.f32 %v453_v51, 0.0  ;;  %v511_v2 = vmax.f32 %v485_v52, 0.0 }
 0x183   : > { %v506_v63 = vmax.f32 %v464_v55, 0.0  ;;  %v514_v0 = vmax.f32 %v496_v56, 0.0 }
 0x184   : > { %v504_v3 = vmax.f32 %v456_v59, 0.0  ;;  %v512_v4 = vmax.f32 %v488_v60, 0.0 }
 0x185   : > { %v818_v5 = vpack.c.bf16 %v506_v63, %v505_v61  ;;  %v838_v6 = vpack.c.bf16 %v514_v0, %v513_v62 }
 0x186   : > { %v813_v7 = vpack.c.bf16 %v504_v3, %v503_v1  ;;  %v833_v8 = vpack.c.bf16 %v512_v4, %v511_v2 }
 0x187   : > { %842 = vst [vmem:[%s1513_s16 + $0x18] sm:$0xff] %v818_v5   ;;  %846 = vst [vmem:[%s1513_s16 + $0x38] sm:$0xff] %v838_v6  }
 0x188   : > { %841 = vst [vmem:[%s1513_s16 + $0x10] sm:$0xff] %v813_v7   ;;  %845 = vst [vmem:[%s1513_s16 + $0x30] sm:$0xff] %v833_v8  }
 0x189   : > { %1130 = shalt.err (!%p1127_p8)
}
 0x18a   : > { %s1131_s19 = scalar_lea.hbm %s1525_s2, 1024  ;;  %s1135_s12 = scalar_lea.hbm %s1638_s24, 4096 }
 0x18b   : > { %p1132_p11 = scmp.ne.s32.totalorder %s1525_s2, %s1131_s19  ;;  %p1136_p9 = scmp.lt.u32.totalorder %s1525_s2, %s1638_s24 }
 0x18c   : > { %p1137_p13 = scmp.lt.u32.totalorder %s1135_s12, %s1131_s19  ;;  %p1139_p7 = scmp.lt.u32.totalorder %s1131_s19, %s1525_s2 }
 0x18d   : > { %p1133_p1 = pnand %p1132_p11, %p1639_p10 }
 0x18e   : > { %p1138_p6 = por %p1137_p13, %p1136_p9 }
 0x18f   : > { %p1134_p4 = pneg %p1133_p1 }
 0x190   : > { %p1140_p12 = por %p1139_p7, %p1138_p6 }
 0x192   : > { %p1141_p0 = pnand %p1140_p12, %p1134_p4 }
 0x194   : > { %1144 = shalt.err (!%p1141_p0)
}
 0x195   : > { %s1253_s21 = smov 64   ;;  %s1254_s17 = smov 4  }
 0x196   : > { %919 = dma.vmem_to_hbm [thread:$0]  (%p1639_p10), %s1520_s5, 1024, %s1525_s2, %s1533_s23, %s1253_s21, %s1253_s21, %s1254_s17  }
 0x197 PF: > { %s1640_s16 = sld [smem:[#allocation16_spill]]  ;;  %s1641_s0 = sld [smem:[#allocation19_spill]] }
 0x198   : > { %p938_p2 = scmp.ge.s32.totalorder %s1245_s8, 2 }
 0x19d   : > { %s626_s30 = sand.u32 1, %s1640_s16   ;;  %p1642_p3 = scmp.ne.s32.totalorder %s1641_s0, 0 }
 0x19e   : > { %s627_s18 = scalar_lea.sflag [#allocation6], %s626_s30 }
 0x19f   : > { %p932_p5 = pnand %p938_p2, %p1642_p3 }
 0x1a1   : > { %1200 = dma.done.wait (!%p932_p5), %s627_s18, 1024  }
 0x1a2   : > { %1202 = vsyncadd (!%p932_p5), %s627_s18, 4294966272  ;;  %s25_s8 = sadd.s32 1, %s1245_s8   ;;  %s1643_s22 = sld [smem:[#allocation17_spill]] }
 0x1a3   : > { %p22_p8 = scmp.ge.s32.totalorder %s25_s8, 6   ;;  %s1644_s30 = sld [smem:[#allocation22_spill]] }
 0x1a4   : > { %s1645_s4 = sld [smem:[#allocation20_spill]]  ;;  %s1646_s2 = sld [smem:[#allocation21_spill]] }
 0x1a5   : > { %s1647_s25 = smov %s1209_s26  ;;  %s1648_s26 = smov %s1213_s27 }
 0x1a6   : > { %s1649_s27 = smov %s1427_s10  ;;  %s1650_s28 = smov %s1221_s29 }
 0x1a7   : > { %s1652_s0 = smov %s1237_s6  ;;  %s1653_s5 = smov %s1241_s7 }
 0x1a8   : > { %s1651_s29 = smov %s1643_s22  ;;  %24 = sbr.rel (!%p22_p8) target bundleno = 23 (0x17), region = 85 }
 0x1aa   : > { %s1654_s6 = smov %s1645_s4  ;;  %s1655_s7 = smov %s1646_s2 }
 0x1af   :  { %632 = vsyncpa [#allocation5], 1 }
 0x1b0   :  { %634 = vsyncpa [#allocation5 + $0x1], 1 }
 0x1b1   :  { %635 = vsyncpa [#allocation8], 1 }
 0x1b2   :  { %636 = vsyncpa [#allocation6], 1 }
 0x1b3   :  { %638 = vsyncpa [#allocation6 + $0x1], 1 }

</bundles_post_ra>
